<compile_context>
chip_gen: v5e
topology: v5e:2x2
jax: 0.10.0
libtpu: 0.0.40
codegen_flags: <defaults>
</compile_context>

<pallas_src>
import functools

import jax
import jax.numpy as jnp
from jax.experimental import pallas as pl
from jax.experimental.pallas import tpu as pltpu

# ---------------------------------------------------------------------------
# Model dimensions
# ---------------------------------------------------------------------------
D_IN = 32
H = 50
H2 = 12
LATENT = 3
BATCH = 16
PAD = 128            # lane padding for every feature dim
BIAS_LANE = PAD - 1  # reserved constant-1 lane carrying the folded bias
N_LAYERS = 5         # per path (encoder / decoder)
BN_EPS = 1e-5
W_DTYPE = jnp.bfloat16


# ---------------------------------------------------------------------------
# Pallas kernels
# ---------------------------------------------------------------------------
def mlp5_kernel(x_ref, w_ref, o_ref, h_ref):
    """5 fused (linear + folded-BN) layers; ReLU on all but the last.

    x_ref: (B, D)            raw input (D = 32 for encode, 3 for decode)
    w_ref: (5, 128, 128)     bf16 slab: W*s in [:K,:N], t in row BIAS_LANE,
                             carry 1.0 at [BIAS_LANE, BIAS_LANE]
    o_ref: (B, 128)          lane-dense output slab
    h_ref: (B, 128) f32      VMEM scratch used to pad the input in-kernel
    """
    b, d = x_ref.shape
    lane = jax.lax.broadcasted_iota(jnp.int32, (b, PAD), 1)
    h_ref[...] = (lane == BIAS_LANE).astype(jnp.float32)   # zeros + bias-lane 1.0
    h_ref[:, :d] = x_ref[...]
    h = h_ref[...]
    for l in range(N_LAYERS):                               # unrolled on purpose
        w = w_ref[l].astype(jnp.float32)
        y = jnp.dot(h, w, preferred_element_type=jnp.float32)
        if l < N_LAYERS - 1:
            y = jnp.maximum(y, 0.0)
        h = y
    o_ref[...] = h


def fused_vae_kernel(x_ref, w_ref, lat_ref, rec_ref, h_ref):
    """Full encode + (eval-mode) reparameterize + decode in one pallas_call.

    w_ref: (10, 128, 128) bf16; layers 0..4 encoder, 5..9 decoder.
    lat_ref: (B, 128) with mu in lanes [0,3), logvar in lanes [3,6).
    rec_ref: (B, 128) reconstruction in lanes [0,32).
    The latent slab is explicitly masked to the mu lanes (+ bias lane) before
    the decoder, so decode(z=mu) holds regardless of weight-slab padding.
    """
    b, d = x_ref.shape
    lane = jax.lax.broadcasted_iota(jnp.int32, (b, PAD), 1)
    h_ref[...] = (lane == BIAS_LANE).astype(jnp.float32)
    h_ref[:, :d] = x_ref[...]
    h = h_ref[...]
    for l in range(2 * N_LAYERS):
        w = w_ref[l].astype(jnp.float32)
        y = jnp.dot(h, w, preferred_element_type=jnp.float32)
        if l not in (N_LAYERS - 1, 2 * N_LAYERS - 1):        # no ReLU after fc21/22, linear6
            y = jnp.maximum(y, 0.0)
        h = y
        if l == N_LAYERS - 1:
            lat_ref[...] = h
            keep = (lane < LATENT) | (lane == BIAS_LANE)      # z = mu, keep bias carry
            h = jnp.where(keep, h, 0.0)
    rec_ref[...] = h


# ---------------------------------------------------------------------------
# Parameter construction (deterministic, in-script) + packing into slabs
# ---------------------------------------------------------------------------
def _linear(key, fan_in, fan_out):
    kw, kb = jax.random.split(key)
    bound = 1.0 / jnp.sqrt(fan_in)
    w = jax.random.uniform(kw, (fan_in, fan_out), jnp.float32, -bound, bound)
    b = jax.random.uniform(kb, (fan_out,), jnp.float32, -bound, bound)
    return w, b


def _bn(key, feat):
    k1, k2, k3, k4 = jax.random.split(key, 4)
    gamma = 1.0 + 0.1 * jax.random.normal(k1, (feat,), jnp.float32)
    beta = 0.1 * jax.random.normal(k2, (feat,), jnp.float32)
    mean = 0.1 * jax.random.normal(k3, (feat,), jnp.float32)
    var = 1.0 + 0.1 * jax.random.uniform(k4, (feat,), jnp.float32)
    return gamma, beta, mean, var


def _fold(bias, bn):
    """BN(xW + b) = (xW) * s + t with s = gamma/sqrt(var+eps), t = (b-mean)*s+beta."""
    gamma, beta, mean, var = bn
    s = gamma / jnp.sqrt(var + BN_EPS)
    t = (bias - mean) * s + beta
    return s, t


def _pack_folded(layers, dtype=W_DTYPE):
    """Pack (W(K,N), s(N,), t(N,)) layers into a zero-padded (L,128,128) slab:
         slab[l, :K, :N]          = W * s          (scale folded into columns)
         slab[l, BIAS_LANE, :N]   = t              (shift via constant-1 lane)
         slab[l, BIAS_LANE, BIAS_LANE] = 1.0       (carry the 1 forward)
    """
    L = len(layers)
    slab = jnp.zeros((L, PAD, PAD), jnp.float32)
    for l, (w, s, t) in enumerate(layers):
        k, n = w.shape
        slab = slab.at[l, :k, :n].set(w * s[None, :])
        slab = slab.at[l, BIAS_LANE, :n].set(t)
        slab = slab.at[l, BIAS_LANE, BIAS_LANE].set(1.0)
    return slab.astype(dtype)


def make_params(seed=0):
    keys = iter(jax.random.split(jax.random.PRNGKey(seed), 24))

    def lin_bn(fan_in, fan_out):
        w, b = _linear(next(keys), fan_in, fan_out)
        s, t = _fold(b, _bn(next(keys), fan_out))
        return (w, s, t)

    # encoder: linear1/lin_bn1, linear2/lin_bn2, linear3/lin_bn3, fc1/bn1, [fc21|fc22]
    enc = [
        lin_bn(D_IN, H),
        lin_bn(H, H2),
        lin_bn(H2, H2),
        lin_bn(H2, LATENT),
    ]
    w21, b21 = _linear(next(keys), LATENT, LATENT)
    w22, b22 = _linear(next(keys), LATENT, LATENT)
    enc.append((jnp.concatenate([w21, w22], axis=1),          # (3, 6) fused fc21|fc22
                jnp.ones((2 * LATENT,), jnp.float32),          # scale = 1 (no BN)
                jnp.concatenate([b21, b22])))                  # shift = bias

    # decoder: fc3/fc_bn3, fc4/fc_bn4, linear4/lin_bn4, linear5/lin_bn5, linear6/lin_bn6
    dec = [
        lin_bn(LATENT, LATENT),
        lin_bn(LATENT, H2),
        lin_bn(H2, H2),
        lin_bn(H2, H),
        lin_bn(H, D_IN),
    ]

    packed = {
        "encode": _pack_folded(enc),
        "decode": _pack_folded(dec),
        "fused": _pack_folded(enc + dec),
    }
    raw = {"encode": enc, "decode": dec}
    return packed, raw


# ---------------------------------------------------------------------------
# pallas_call wrappers
# ---------------------------------------------------------------------------
_VMEM = pl.BlockSpec(memory_space=pltpu.MemorySpace.VMEM)


def _cost(n_layers, batch, in_feat, n_out_slabs, w):
    return pl.CostEstimate(
        flops=2 * batch * PAD * PAD * n_layers,
        transcendentals=0,
        bytes_accessed=int(w.size) * 2 + batch * in_feat * 4 + n_out_slabs * batch * PAD * 4,
    )


@functools.partial(jax.jit, static_argnames=("function",))
def autoencoder_forward(params, x, function="encode"):
    """Matches Autoencoder.forward(x, function) in eval mode."""
    w = params[function]                       # (5, 128, 128) bf16 slab
    x = x.astype(jnp.float32)
    b = x.shape[0]
    out = pl.pallas_call(
        mlp5_kernel,
        out_shape=jax.ShapeDtypeStruct((b, PAD), jnp.float32),
        in_specs=[_VMEM, _VMEM],
        out_specs=_VMEM,
        scratch_shapes=[pltpu.VMEM((b, PAD), jnp.float32)],
        cost_estimate=_cost(N_LAYERS, b, x.shape[1], 1, w),
    )(x, w)
    if function == "encode":
        mu = out[:, :LATENT]
        logvar = out[:, LATENT:2 * LATENT]
        return mu, mu, logvar                  # z == mu (eval-mode reparameterize)
    return out[:, :D_IN]


@jax.jit
def autoencoder_roundtrip(params, x):
    """encode -> reparameterize(eval) -> decode in ONE pallas_call (preferred path)."""
    w = params["fused"]                        # (10, 128, 128) bf16 slab
    x = x.astype(jnp.float32)
    b = x.shape[0]
    lat, rec = pl.pallas_call(
        fused_vae_kernel,
        out_shape=(jax.ShapeDtypeStruct((b, PAD), jnp.float32),
                   jax.ShapeDtypeStruct((b, PAD), jnp.float32)),
        in_specs=[_VMEM, _VMEM],
        out_specs=(_VMEM, _VMEM),
        scratch_shapes=[pltpu.VMEM((b, PAD), jnp.float32)],
        cost_estimate=_cost(2 * N_LAYERS, b, x.shape[1], 2, w),
    )(x, w)
    mu = lat[:, :LATENT]
    logvar = lat[:, LATENT:2 * LATENT]
    return rec[:, :D_IN], mu, logvar


# ---------------------------------------------------------------------------
# Pure-JAX references (unpadded) for correctness checks
# ---------------------------------------------------------------------------
def _ref_mlp_f32(layers, x):
    """Unquantized folded math (== eval-mode module semantics)."""
    h = x
    for i, (w, s, t) in enumerate(layers):
        h = h @ w * s + t
        if i < len(layers) - 1:
            h = jnp.maximum(h, 0.0)
    return h


def _quantize_fold(layers, dtype=W_DTYPE):
    """Same bf16 quantization of the folded weights that the kernel slabs use."""
    out = []
    for (w, s, t) in layers:
        wq = (w * s[None, :]).astype(dtype).astype(jnp.float32)
        tq = t.astype(dtype).astype(jnp.float32)
        out.append((wq, tq))
    return out


def _ref_mlp_quant(qlayers, x):
    h = x
    for i, (wq, tq) in enumerate(qlayers):
        h = h @ wq + tq
        if i < len(qlayers) - 1:
            h = jnp.maximum(h, 0.0)
    return h


# ---------------------------------------------------------------------------
if __name__ == "__main__":
    params, raw = make_params(seed=0)
    x = jax.random.normal(jax.random.PRNGKey(0), (BATCH, D_IN), jnp.float32)

    # module API: forward(x, 'encode') then forward(z, 'decode') — two pallas_calls
    z, mu, logvar = autoencoder_forward(params, x, function="encode")
    jax.block_until_ready((z, mu, logvar))
    recon = autoencoder_forward(params, z, function="decode")
    jax.block_until_ready(recon)

    # fused round trip — single pallas_call (preferred)
    f_recon, f_mu, f_logvar = autoencoder_roundtrip(params, x)
    jax.block_until_ready((f_recon, f_mu, f_logvar))

    # --- tight check: reference with identically bf16-quantized folded weights ---
    enc_q = _quantize_fold(raw["encode"])
    dec_q = _quantize_fold(raw["decode"])
    enc_out = _ref_mlp_quant(enc_q, x)
    rmu, rlv = enc_out[:, :LATENT], enc_out[:, LATENT:2 * LATENT]
    rz = rmu
    rrec = _ref_mlp_quant(dec_q, rz)

    assert jnp.allclose(mu, rmu, atol=1e-4, rtol=1e-4), "mu mismatch"
    assert jnp.allclose(logvar, rlv, atol=1e-4, rtol=1e-4), "logvar mismatch"
    assert jnp.allclose(z, rz, atol=1e-4, rtol=1e-4), "z mismatch"
    assert jnp.allclose(recon, rrec, atol=1e-4, rtol=1e-4), "decode mismatch"
    assert jnp.allclose(f_mu, rmu, atol=1e-4, rtol=1e-4), "fused mu mismatch"
    assert jnp.allclose(f_logvar, rlv, atol=1e-4, rtol=1e-4), "fused logvar mismatch"
    assert jnp.allclose(f_recon, rrec, atol=1e-4, rtol=1e-4), "fused recon mismatch"

    # --- loose sanity check vs unquantized f32 module math (bf16 weight rounding) ---
    enc_f = _ref_mlp_f32(raw["encode"], x)
    fmu, flv = enc_f[:, :LATENT], enc_f[:, LATENT:2 * LATENT]
    frec = _ref_mlp_f32(raw["decode"], fmu)
    assert jnp.allclose(f_mu, fmu, atol=5e-2, rtol=5e-2), "mu vs f32 semantics"
    assert jnp.allclose(f_logvar, flv, atol=5e-2, rtol=5e-2), "logvar vs f32 semantics"
    assert jnp.allclose(f_recon, frec, atol=5e-2, rtol=5e-2), "recon vs f32 semantics"

    print("KERNEL_OK")
</pallas_src>

<mosaic_0001>
module attributes {stable_mosaic.version = 11 : i64} {
  func.func @mlp5_kernel(%arg0: memref<16x32xf32, #tpu.memory_space<vmem>>, %arg1: memref<5x128x128xbf16, #tpu.memory_space<vmem>>, %arg2: memref<16x128xf32, #tpu.memory_space<vmem>>, %arg3: memref<16x128xf32, #tpu.memory_space<vmem>>) attributes {dimension_semantics = [], scalar_prefetch = 0 : i64, scratch_operands = 1 : i64, tpu.core_type = #tpu.core_type<tc>} {
    %0 = tpu.iota {dimensions = array<i32: 1>} : vector<16x128xi32>
    %c127_i32 = arith.constant 127 : i32
    %1 = vector.broadcast %c127_i32 : i32 to vector<16x128xi32>
    %2 = arith.cmpi eq, %0, %1 : vector<16x128xi32>
    %3 = arith.extui %2 : vector<16x128xi1> to vector<16x128xi32>
    %4 = arith.sitofp %3 : vector<16x128xi32> to vector<16x128xf32>
    %c0 = arith.constant 0 : index
    %c0_0 = arith.constant 0 : index
    %5 = vector.load %arg3[%c0, %c0_0] : memref<16x128xf32, #tpu.memory_space<vmem>>, vector<16x128xf32>
    tpu.vector_store %arg3[%c0, %c0_0], %4 {strides = array<i32>} : memref<16x128xf32, #tpu.memory_space<vmem>>, vector<16x128xf32>,
    %c0_1 = arith.constant 0 : index
    %c0_2 = arith.constant 0 : index
    %6 = vector.load %arg0[%c0_1, %c0_2] : memref<16x32xf32, #tpu.memory_space<vmem>>, vector<16x32xf32>
    %c0_3 = arith.constant 0 : index
    %c0_4 = arith.constant 0 : index
    %7 = vector.load %arg3[%c0_3, %c0_4] : memref<16x128xf32, #tpu.memory_space<vmem>>, vector<16x32xf32>
    tpu.vector_store %arg3[%c0_3, %c0_4], %6 {strides = array<i32>} : memref<16x128xf32, #tpu.memory_space<vmem>>, vector<16x32xf32>,
    %c0_5 = arith.constant 0 : index
    %c0_6 = arith.constant 0 : index
    %8 = vector.load %arg3[%c0_5, %c0_6] : memref<16x128xf32, #tpu.memory_space<vmem>>, vector<16x128xf32>
    %c0_7 = arith.constant 0 : index
    %c0_8 = arith.constant 0 : index
    %c0_9 = arith.constant 0 : index
    %9 = vector.load %arg1[%c0_7, %c0_8, %c0_9] : memref<5x128x128xbf16, #tpu.memory_space<vmem>>, vector<1x128x128xbf16>
    %10 = vector.shape_cast %9 : vector<1x128x128xbf16> to vector<128x128xbf16>
    %11 = arith.extf %10 : vector<128x128xbf16> to vector<128x128xf32>
    %cst = arith.constant dense<0.000000e+00> : vector<16x128xf32>
    %12 = tpu.matmul %8, %11, %cst {dimension_numbers = #tpu.dot_dimension_numbers<[1], [0], [0], [1], [0, 0, 1, 1], [], []>} : vector<16x128xf32>, vector<128x128xf32>, vector<16x128xf32> -> vector<16x128xf32>
    %cst_10 = arith.constant 0.000000e+00 : f32
    %13 = vector.broadcast %cst_10 : f32 to vector<16x128xf32>
    %14 = arith.maximumf %12, %13 : vector<16x128xf32>
    %c1 = arith.constant 1 : index
    %c0_11 = arith.constant 0 : index
    %c0_12 = arith.constant 0 : index
    %15 = vector.load %arg1[%c1, %c0_11, %c0_12] : memref<5x128x128xbf16, #tpu.memory_space<vmem>>, vector<1x128x128xbf16>
    %16 = vector.shape_cast %15 : vector<1x128x128xbf16> to vector<128x128xbf16>
    %17 = arith.extf %16 : vector<128x128xbf16> to vector<128x128xf32>
    %cst_13 = arith.constant dense<0.000000e+00> : vector<16x128xf32>
    %18 = tpu.matmul %14, %17, %cst_13 {dimension_numbers = #tpu.dot_dimension_numbers<[1], [0], [0], [1], [0, 0, 1, 1], [], []>} : vector<16x128xf32>, vector<128x128xf32>, vector<16x128xf32> -> vector<16x128xf32>
    %cst_14 = arith.constant 0.000000e+00 : f32
    %19 = vector.broadcast %cst_14 : f32 to vector<16x128xf32>
    %20 = arith.maximumf %18, %19 : vector<16x128xf32>
    %c2 = arith.constant 2 : index
    %c0_15 = arith.constant 0 : index
    %c0_16 = arith.constant 0 : index
    %21 = vector.load %arg1[%c2, %c0_15, %c0_16] : memref<5x128x128xbf16, #tpu.memory_space<vmem>>, vector<1x128x128xbf16>
    %22 = vector.shape_cast %21 : vector<1x128x128xbf16> to vector<128x128xbf16>
    %23 = arith.extf %22 : vector<128x128xbf16> to vector<128x128xf32>
    %cst_17 = arith.constant dense<0.000000e+00> : vector<16x128xf32>
    %24 = tpu.matmul %20, %23, %cst_17 {dimension_numbers = #tpu.dot_dimension_numbers<[1], [0], [0], [1], [0, 0, 1, 1], [], []>} : vector<16x128xf32>, vector<128x128xf32>, vector<16x128xf32> -> vector<16x128xf32>
    %cst_18 = arith.constant 0.000000e+00 : f32
    %25 = vector.broadcast %cst_18 : f32 to vector<16x128xf32>
    %26 = arith.maximumf %24, %25 : vector<16x128xf32>
    %c3 = arith.constant 3 : index
    %c0_19 = arith.constant 0 : index
    %c0_20 = arith.constant 0 : index
    %27 = vector.load %arg1[%c3, %c0_19, %c0_20] : memref<5x128x128xbf16, #tpu.memory_space<vmem>>, vector<1x128x128xbf16>
    %28 = vector.shape_cast %27 : vector<1x128x128xbf16> to vector<128x128xbf16>
    %29 = arith.extf %28 : vector<128x128xbf16> to vector<128x128xf32>
    %cst_21 = arith.constant dense<0.000000e+00> : vector<16x128xf32>
    %30 = tpu.matmul %26, %29, %cst_21 {dimension_numbers = #tpu.dot_dimension_numbers<[1], [0], [0], [1], [0, 0, 1, 1], [], []>} : vector<16x128xf32>, vector<128x128xf32>, vector<16x128xf32> -> vector<16x128xf32>
    %cst_22 = arith.constant 0.000000e+00 : f32
    %31 = vector.broadcast %cst_22 : f32 to vector<16x128xf32>
    %32 = arith.maximumf %30, %31 : vector<16x128xf32>
    %c4 = arith.constant 4 : index
    %c0_23 = arith.constant 0 : index
    %c0_24 = arith.constant 0 : index
    %33 = vector.load %arg1[%c4, %c0_23, %c0_24] : memref<5x128x128xbf16, #tpu.memory_space<vmem>>, vector<1x128x128xbf16>
    %34 = vector.shape_cast %33 : vector<1x128x128xbf16> to vector<128x128xbf16>
    %35 = arith.extf %34 : vector<128x128xbf16> to vector<128x128xf32>
    %cst_25 = arith.constant dense<0.000000e+00> : vector<16x128xf32>
    %36 = tpu.matmul %32, %35, %cst_25 {dimension_numbers = #tpu.dot_dimension_numbers<[1], [0], [0], [1], [0, 0, 1, 1], [], []>} : vector<16x128xf32>, vector<128x128xf32>, vector<16x128xf32> -> vector<16x128xf32>
    %c0_26 = arith.constant 0 : index
    %c0_27 = arith.constant 0 : index
    %37 = vector.load %arg2[%c0_26, %c0_27] : memref<16x128xf32, #tpu.memory_space<vmem>>, vector<16x128xf32>
    tpu.vector_store %arg2[%c0_26, %c0_27], %36 {strides = array<i32>} : memref<16x128xf32, #tpu.memory_space<vmem>>, vector<16x128xf32>,
    return
  }
}

</mosaic_0001>

<bundles_post_ra>
// kernel: autoencoder_forward.1
= control target key start
LH: loop header
LB: loop body
LE: loop exit
PB: predicated region body
PF: predicated region fallthrough
CT: control target
= control target key end

     0   :  { %7 = vsyncpa [#allocation4], 0  ;;  %s657_s0 = inlined_call_operand.hbm [shape: f32[16,32], index: 0, kind: input, shape index: {}]   ;;  %s658_s1 = inlined_call_operand.hbm [shape: bf16[5,128,128], index: 1, kind: input, shape index: {}]   ;;  %s659_s2 = inlined_call_operand.vmem [shape: f32[16,128], index: 2, kind: output, shape index: {}]  }
   0x1   :  { %s13_s11 = sshll.u32 %s657_s0, 4  ;;  %s14_s11 = int_to_ptr.hbm [resolvable:$true] %s13_s11 }
   0x2   :  { %8 = vsyncpa [#allocation6], 0  ;;  %s623_s12 = smov [#allocation3]   ;;  %s26_s16 = sshll.u32 %s658_s1, 4  ;;  %s27_s16 = int_to_ptr.hbm [resolvable:$true] %s26_s16 }
   0x3   :  { %s15_s13 = sshll.u32 %s623_s12, 4  ;;  %s624_s17 = smov 128   ;;  %s16_s13 = int_to_ptr.vmem [resolvable:$true] %s15_s13 }
   0x4   :  { %s625_s18 = smov 8   ;;  %s626_s19 = smov [#allocation5]  }
   0x5   :  { %21 = dma.hbm_to_vmem [thread:$0]  %s14_s11, 256, %s16_s13, [#allocation4], %s624_s17, %s624_s17, %s625_s18  }
   0x6   :  { %s28_s20 = sshll.u32 %s626_s19, 4  ;;  %s627_s21 = smov 64   ;;  %s29_s20 = int_to_ptr.vmem [resolvable:$true] %s28_s20 }
   0x7   :  { %s628_s22 = smov 4  }
   0x8   :  { %34 = dma.hbm_to_vmem [thread:$0]  %s27_s16, 5120, %s29_s20, [#allocation6], %s627_s21, %s627_s21, %s628_s22  }
   0x9   :  { %619 = dma.done.wait [#allocation4], 256  }
   0xa   :  { %620 = vsyncadd [#allocation4], 4294967040 }
   0xb   :  { %621 = dma.done.wait [#allocation6], 5120  }
   0xc   :  { %622 = vsyncadd [#allocation6], 4294962176  ;;  %v43_v0 = vlaneseq  ;;  %v629_v2 = vmov 0.0   ;;  %v519_v4 = vld [vmem:[#allocation5 + $0x38] sm:$0xff]   ;;  %v518_v5 = vld [vmem:[#allocation5 + $0x30] sm:$0xff]   ;;  %vm52_vm1 = vcmask 261120  }
   0xd   :  { %v384_v6 = vunpack.c.h.bf16 %v519_v4  ;;  %v383_v7 = vunpack.c.l.bf16 %v519_v4  ;;  %v50_v8 = vld [vmem:[#allocation3] sm:$0xff]  ;;  %v380_v9 = vunpack.c.h.bf16 %v518_v5  ;;  %v51_v10 = vld [vmem:[#allocation3 + $0x8] sm:$0xff]  ;;  %v517_v11 = vld [vmem:[#allocation5 + $0x28] sm:$0xff]   ;;  %v379_v12 = vunpack.c.l.bf16 %v518_v5 }
   0xe   :  { %v44_v1 = vand.u32 127, %v43_v0  ;;  %v376_v13 = vunpack.c.h.bf16 %v517_v11  ;;  %v516_v14 = vld [vmem:[#allocation5 + $0x20] sm:$0xff]   ;;  %v375_v15 = vunpack.c.l.bf16 %v517_v11  ;;  %v526_v16 = vld [vmem:[#allocation5 + $0x78] sm:$0xff]   ;;  %v525_v17 = vld [vmem:[#allocation5 + $0x70] sm:$0xff]  }
   0xf   :  { %89 = vmatpush.msra.mxu0 %v384_v6  ;;  %v372_v18 = vunpack.c.h.bf16 %v516_v14  ;;  %v416_v19 = vunpack.c.h.bf16 %v526_v16  ;;  %v415_v20 = vunpack.c.l.bf16 %v526_v16  ;;  %v515_v21 = vld [vmem:[#allocation5 + $0x18] sm:$0xff]   ;;  %v371_v22 = vunpack.c.l.bf16 %v516_v14  ;;  %v524_v24 = vld [vmem:[#allocation5 + $0x68] sm:$0xff]   ;;  %v514_v27 = vld [vmem:[#allocation5 + $0x10] sm:$0xff]  }
  0x10   :  { %vm45_vm0 = vcmp.eq.s32.totalorder %v44_v1, 127  ;;  %v412_v23 = vunpack.c.h.bf16 %v525_v17  ;;  %v368_v25 = vunpack.c.h.bf16 %v515_v21  ;;  %v411_v26 = vunpack.c.l.bf16 %v525_v17  ;;  %v523_v30 = vld [vmem:[#allocation5 + $0x60] sm:$0xff]   ;;  %v513_v33 = vld [vmem:[#allocation5 + $0x8] sm:$0xff]   ;;  %v522_v36 = vld [vmem:[#allocation5 + $0x58] sm:$0xff]  }
  0x11   :  { %v352_v3 = vsel %vm45_vm0, 1.0, %v629_v2  ;;  %90 = vmatpush.msra.mxu0 %v383_v7  ;;  %147 = vmatpush.msra.mxu1 %v416_v19  ;;  %v367_v28 = vunpack.c.l.bf16 %v515_v21  ;;  %v408_v29 = vunpack.c.h.bf16 %v524_v24  ;;  %v364_v31 = vunpack.c.h.bf16 %v514_v27  ;;  %v354_v39 = vld [vmem:[#allocation5] sm:$0xff]   ;;  %v521_v42 = vld [vmem:[#allocation5 + $0x50] sm:$0xff]   ;;  %v520_v47 = vld [vmem:[#allocation5 + $0x48] sm:$0xff]  }
  0x12   :  { %48 = vst [vmem:[#allocation2] sm:$0xff] %v352_v3  ;;  %v407_v32 = vunpack.c.l.bf16 %v524_v24  ;;  %v363_v34 = vunpack.c.l.bf16 %v514_v27  ;;  %v404_v35 = vunpack.c.h.bf16 %v523_v30  ;;  %v360_v37 = vunpack.c.h.bf16 %v513_v33  ;;  %v386_v53 = vld [vmem:[#allocation5 + $0x40] sm:$0xff]   ;;  %v533_v56 = vld [vmem:[#allocation5 + $0xb8] sm:$0xff]   ;;  %v532_v57 = vld [vmem:[#allocation5 + $0xb0] sm:$0xff]  }
  0x13   :  { %49 = vst [vmem:[#allocation2 + $0x8] sm:$0xff] %v352_v3  ;;  %91 = vmatpush.msra.mxu0 %v380_v9  ;;  %148 = vmatpush.msra.mxu1 %v415_v20  ;;  %v403_v38 = vunpack.c.l.bf16 %v523_v30  ;;  %v359_v40 = vunpack.c.l.bf16 %v513_v33  ;;  %v400_v41 = vunpack.c.h.bf16 %v522_v36  ;;  %v356_v43 = vunpack.c.h.bf16 %v354_v39  ;;  %v531_v61 = vld [vmem:[#allocation5 + $0xa8] sm:$0xff]   ;;  %v530_v0 = vld [vmem:[#allocation5 + $0xa0] sm:$0xff]   ;;  %v529_v3 = vld [vmem:[#allocation5 + $0x98] sm:$0xff]  }
  0x14   :  { %53 = vst.msk [vmem:[#allocation2] sm:$0xff] %vm52_vm1, %v50_v8  ;;  %v399_v44 = vunpack.c.l.bf16 %v522_v36  ;;  %v355_v45 = vunpack.c.l.bf16 %v354_v39  ;;  %v396_v46 = vunpack.c.h.bf16 %v521_v42  ;;  %v395_v49 = vunpack.c.l.bf16 %v521_v42  ;;  %v528_v6 = vld [vmem:[#allocation5 + $0x90] sm:$0xff]   ;;  %v527_v9 = vld [vmem:[#allocation5 + $0x88] sm:$0xff]   ;;  %v418_v17 = vld [vmem:[#allocation5 + $0x80] sm:$0xff]  }
  0x15   :  { %54 = vst.msk [vmem:[#allocation2 + $0x8] sm:$0xff] %vm52_vm1, %v51_v10  ;;  %92 = vmatpush.msra.mxu0 %v379_v12  ;;  %149 = vmatpush.msra.mxu1 %v412_v23  ;;  %v392_v50 = vunpack.c.h.bf16 %v520_v47  ;;  %v391_v51 = vunpack.c.l.bf16 %v520_v47  ;;  %v388_v54 = vunpack.c.h.bf16 %v386_v53  ;;  %v387_v55 = vunpack.c.l.bf16 %v386_v53  ;;  %v540_v20 = vld [vmem:[#allocation5 + $0xf8] sm:$0xff]   ;;  %v539_v21 = vld [vmem:[#allocation5 + $0xf0] sm:$0xff]   ;;  %v545_v53 = vld [vmem:[#allocation5 + $0x128] sm:$0xff]  }
  0x16   :  { %v448_v58 = vunpack.c.h.bf16 %v533_v56  ;;  %v447_v59 = vunpack.c.l.bf16 %v533_v56  ;;  %v444_v60 = vunpack.c.h.bf16 %v532_v57  ;;  %v443_v62 = vunpack.c.l.bf16 %v532_v57  ;;  %v544_v56 = vld [vmem:[#allocation5 + $0x120] sm:$0xff]  }
  0x17   :  { %93 = vmatpush.msra.mxu0 %v376_v13  ;;  %150 = vmatpush.msra.mxu1 %v411_v26  ;;  %v440_v63 = vunpack.c.h.bf16 %v531_v61  ;;  %v439_v1 = vunpack.c.l.bf16 %v531_v61  ;;  %v436_v2 = vunpack.c.h.bf16 %v530_v0  ;;  %v435_v4 = vunpack.c.l.bf16 %v530_v0 }
  0x18   :  { %205 = vmatpush.msra.mxu2 %v448_v58  ;;  %v432_v5 = vunpack.c.h.bf16 %v529_v3  ;;  %v431_v7 = vunpack.c.l.bf16 %v529_v3  ;;  %v428_v8 = vunpack.c.h.bf16 %v528_v6  ;;  %v427_v11 = vunpack.c.l.bf16 %v528_v6 }
  0x19   :  { %94 = vmatpush.msra.mxu0 %v375_v15  ;;  %151 = vmatpush.msra.mxu1 %v408_v29  ;;  %v424_v13 = vunpack.c.h.bf16 %v527_v9  ;;  %v423_v14 = vunpack.c.l.bf16 %v527_v9  ;;  %v419_v19 = vunpack.c.l.bf16 %v418_v17  ;;  %v479_v23 = vunpack.c.l.bf16 %v540_v20  ;;  %v482_v9 = vld [vmem:[#allocation5 + $0x100] sm:$0xff]  }
  0x1a   :  { %206 = vmatpush.msra.mxu2 %v447_v59  ;;  %v476_v24 = vunpack.c.h.bf16 %v539_v21  ;;  %v475_v26 = vunpack.c.l.bf16 %v539_v21  ;;  %v503_v57 = vunpack.c.l.bf16 %v545_v53  ;;  %v500_v58 = vunpack.c.h.bf16 %v544_v56  ;;  %v543_v59 = vld [vmem:[#allocation5 + $0x118] sm:$0xff]  }
  0x1b   :  { %95 = vmatpush.msra.mxu0 %v372_v18  ;;  %152 = vmatpush.msra.mxu1 %v407_v32  ;;  %v55_v48 = vld [vmem:[#allocation2] sm:$0xff]  ;;  %v420_v18 = vunpack.c.h.bf16 %v418_v17  ;;  %v496_v61 = vunpack.c.h.bf16 %v543_v59 }
  0x1c   :  { %v56_v52 = vld [vmem:[#allocation2 + $0x8] sm:$0xff]  ;;  %207 = vmatpush.msra.mxu2 %v444_v60  ;;  %v499_v60 = vunpack.c.l.bf16 %v544_v56 }
  0x1d   :  { %96 = vmatpush.msra.mxu0 %v371_v22  ;;  %153 = vmatpush.msra.mxu1 %v404_v35  ;;  %v480_v22 = vunpack.c.h.bf16 %v540_v20 }
  0x1e   :  { %208 = vmatpush.msra.mxu2 %v443_v62  ;;  %v542_v62 = vld [vmem:[#allocation5 + $0x110] sm:$0xff]  }
  0x1f   :  { %97 = vmatpush.msra.mxu0 %v368_v25  ;;  %154 = vmatpush.msra.mxu1 %v403_v38  ;;  %v538_v25 = vld [vmem:[#allocation5 + $0xe8] sm:$0xff]   ;;  %v492_v0 = vunpack.c.h.bf16 %v542_v62  ;;  %v491_v3 = vunpack.c.l.bf16 %v542_v62 }
  0x20   :  { %209 = vmatpush.msra.mxu2 %v440_v63  ;;  %263 = vmatpush.msra.mxu3 %v480_v22  ;;  %v472_v27 = vunpack.c.h.bf16 %v538_v25  ;;  %v471_v29 = vunpack.c.l.bf16 %v538_v25  ;;  %v495_v63 = vunpack.c.l.bf16 %v543_v59 }
  0x21   :  { %98 = vmatpush.msra.mxu0 %v367_v28  ;;  %155 = vmatpush.msra.mxu1 %v400_v41  ;;  %v537_v28 = vld [vmem:[#allocation5 + $0xe0] sm:$0xff]  }
  0x22   :  { %210 = vmatpush.msra.mxu2 %v439_v1  ;;  %264 = vmatpush.msra.mxu3 %v479_v23  ;;  %v468_v30 = vunpack.c.h.bf16 %v537_v28  ;;  %v467_v32 = vunpack.c.l.bf16 %v537_v28  ;;  %v541_v1 = vld [vmem:[#allocation5 + $0x108] sm:$0xff]  }
  0x23   :  { %99 = vmatpush.msra.mxu0 %v364_v31  ;;  %156 = vmatpush.msra.mxu1 %v399_v44  ;;  %v536_v31 = vld [vmem:[#allocation5 + $0xd8] sm:$0xff]   ;;  %v487_v6 = vunpack.c.l.bf16 %v541_v1 }
  0x24   :  { %211 = vmatpush.msra.mxu2 %v436_v2  ;;  %265 = vmatpush.msra.mxu3 %v476_v24  ;;  %v464_v33 = vunpack.c.h.bf16 %v536_v31  ;;  %v463_v35 = vunpack.c.l.bf16 %v536_v31 }
  0x25   :  { %100 = vmatpush.msra.mxu0 %v363_v34  ;;  %157 = vmatpush.msra.mxu1 %v396_v46  ;;  %v535_v34 = vld [vmem:[#allocation5 + $0xd0] sm:$0xff]  }
  0x26   :  { %212 = vmatpush.msra.mxu2 %v435_v4  ;;  %266 = vmatpush.msra.mxu3 %v475_v26  ;;  %v460_v36 = vunpack.c.h.bf16 %v535_v34  ;;  %v459_v39 = vunpack.c.l.bf16 %v535_v34 }
  0x27   :  { %101 = vmatpush.msra.mxu0 %v360_v37  ;;  %158 = vmatpush.msra.mxu1 %v395_v49  ;;  %v534_v37 = vld [vmem:[#allocation5 + $0xc8] sm:$0xff]   ;;  %v546_v49 = vld [vmem:[#allocation5 + $0x130] sm:$0xff]  }
  0x28   :  { %213 = vmatpush.msra.mxu2 %v432_v5  ;;  %267 = vmatpush.msra.mxu3 %v472_v27  ;;  %v456_v41 = vunpack.c.h.bf16 %v534_v37  ;;  %v455_v42 = vunpack.c.l.bf16 %v534_v37  ;;  %v488_v5 = vunpack.c.h.bf16 %v541_v1 }
  0x29   :  { %102 = vmatpush.msra.mxu0 %v359_v40  ;;  %159 = vmatpush.msra.mxu1 %v392_v50 }
  0x2a   :  { %214 = vmatpush.msra.mxu2 %v431_v7  ;;  %268 = vmatpush.msra.mxu3 %v471_v29 }
  0x2b   :  { %103 = vmatpush.msra.mxu0 %v356_v43  ;;  %160 = vmatpush.msra.mxu1 %v391_v51 }
  0x2c   :  { %215 = vmatpush.msra.mxu2 %v428_v8  ;;  %269 = vmatpush.msra.mxu3 %v468_v30 }
  0x2d   :  { %104 = vmatpush.msra.mxu0 %v355_v45  ;;  %161 = vmatpush.msra.mxu1 %v388_v54  ;;  %v450_v45 = vld [vmem:[#allocation5 + $0xc0] sm:$0xff]   ;;  %v507_v54 = vunpack.c.l.bf16 %v546_v49 }
  0x2e   :  { %105 = vmatmul.f32.vlgmr.msra.gmra.mxu0 %v55_v48  ;;  %216 = vmatpush.msra.mxu2 %v427_v11  ;;  %v452_v46 = vunpack.c.h.bf16 %v450_v45  ;;  %v451_v47 = vunpack.c.l.bf16 %v450_v45  ;;  %v547_v48 = vld [vmem:[#allocation5 + $0x138] sm:$0xff]   ;;  %v483_v11 = vunpack.c.l.bf16 %v482_v9 }
  0x2f   :  { %162 = vmatpush.msra.mxu1 %v387_v55  ;;  %270 = vmatpush.msra.mxu3 %v467_v32  ;;  %v512_v50 = vunpack.c.h.bf16 %v547_v48  ;;  %v511_v51 = vunpack.c.l.bf16 %v547_v48  ;;  %v504_v55 = vunpack.c.h.bf16 %v545_v53 }
  0x30   :  { %217 = vmatpush.msra.mxu2 %v424_v13 }
  0x31   :  { %271 = vmatpush.msra.mxu3 %v464_v33  ;;  %321 = vmatpush.msrb.mxu0 %v512_v50 }
  0x32   :  { %218 = vmatpush.msra.mxu2 %v423_v14  ;;  %548 = vmatpush.msrb.mxu1 %v512_v50 }
  0x33   :  { %272 = vmatpush.msra.mxu3 %v463_v35  ;;  %322 = vmatpush.msrb.mxu0 %v511_v51 }
  0x34   :  { %219 = vmatpush.msra.mxu2 %v420_v18  ;;  %549 = vmatpush.msrb.mxu1 %v511_v51 }
  0x35   :  { %273 = vmatpush.msra.mxu3 %v460_v36 }
  0x36   :  { %108 = vmatmul.f32.gmra.mxu0 %v56_v52  ;;  %220 = vmatpush.msra.mxu2 %v419_v19  ;;  %v508_v52 = vunpack.c.h.bf16 %v546_v49 }
  0x37   :  { %274 = vmatpush.msra.mxu3 %v459_v39 }
  0x38   :  { %323 = vmatpush.msrb.mxu0 %v508_v52  ;;  %550 = vmatpush.msrb.mxu1 %v508_v52 }
  0x39   :  { %275 = vmatpush.msra.mxu3 %v456_v41 }
  0x3a   :  { %324 = vmatpush.msrb.mxu0 %v507_v54  ;;  %551 = vmatpush.msrb.mxu1 %v507_v54 }
  0x3b   :  { %276 = vmatpush.msra.mxu3 %v455_v42 }
  0x3c   :  { %325 = vmatpush.msrb.mxu0 %v504_v55  ;;  %552 = vmatpush.msrb.mxu1 %v504_v55 }
  0x3d   :  { %277 = vmatpush.msra.mxu3 %v452_v46 }
  0x3e   :  { %326 = vmatpush.msrb.mxu0 %v503_v57  ;;  %553 = vmatpush.msrb.mxu1 %v503_v57 }
  0x3f   :  { %278 = vmatpush.msra.mxu3 %v451_v47 }
  0x40   :  { %327 = vmatpush.msrb.mxu0 %v500_v58  ;;  %554 = vmatpush.msrb.mxu1 %v500_v58 }
  0x42   :  { %328 = vmatpush.msrb.mxu0 %v499_v60  ;;  %555 = vmatpush.msrb.mxu1 %v499_v60 }
  0x44   :  { %329 = vmatpush.msrb.mxu0 %v496_v61  ;;  %556 = vmatpush.msrb.mxu1 %v496_v61 }
  0x46   :  { %330 = vmatpush.msrb.mxu0 %v495_v63  ;;  %557 = vmatpush.msrb.mxu1 %v495_v63 }
  0x48   :  { %331 = vmatpush.msrb.mxu0 %v492_v0  ;;  %558 = vmatpush.msrb.mxu1 %v492_v0 }
  0x4a   :  { %332 = vmatpush.msrb.mxu0 %v491_v3  ;;  %559 = vmatpush.msrb.mxu1 %v491_v3 }
  0x4c   :  { %333 = vmatpush.msrb.mxu0 %v488_v5  ;;  %560 = vmatpush.msrb.mxu1 %v488_v5 }
  0x4e   :  { %334 = vmatpush.msrb.mxu0 %v487_v6  ;;  %561 = vmatpush.msrb.mxu1 %v487_v6 }
  0xab   :  { %v106_v10 = vpop.f32.mrf.mxu0 }
  0xac   :  { %v112_v12 = vmax.f32 %v106_v10, 0.0  ;;  %v484_v10 = vunpack.c.h.bf16 %v482_v9 }
  0xae   :  { %163 = vmatmul.f32.vlgmr.msra.gmra.mxu1 %v112_v12  ;;  %335 = vmatpush.msrb.mxu0 %v484_v10 }
  0xaf   :  { %562 = vmatpush.msrb.mxu1 %v484_v10 }
  0xb0   :  { %336 = vmatpush.msrb.mxu0 %v483_v11 }
  0xb1   :  { %563 = vmatpush.msrb.mxu1 %v483_v11 }
  0xb3   :  { %v109_v15 = vpop.f32.mrf.mxu0 }
  0xb4   :  { %v113_v16 = vmax.f32 %v109_v15, 0.0 }
  0xb6   :  { %166 = vmatmul.f32.gmra.mxu1 %v113_v16 }
 0x12b   :  { %v164_v38 = vpop.f32.mrf.mxu1 }
 0x12c   :  { %v170_v40 = vmax.f32 %v164_v38, 0.0 }
 0x12e   :  { %221 = vmatmul.f32.vlgmr.msra.gmra.mxu2 %v170_v40 }
 0x133   :  { %v167_v43 = vpop.f32.mrf.mxu1 }
 0x134   :  { %v171_v44 = vmax.f32 %v167_v43, 0.0 }
 0x136   :  { %224 = vmatmul.f32.gmra.mxu2 %v171_v44 }
 0x1b1   :  { %v222_v2 = vpop.f32.mrf.mxu2 }
 0x1b2   :  { %v228_v4 = vmax.f32 %v222_v2, 0.0 }
 0x1b4   :  { %279 = vmatmul.f32.vlgmr.msra.gmra.mxu3 %v228_v4 }
 0x1b9   :  { %v225_v7 = vpop.f32.mrf.mxu2 }
 0x1ba   :  { %v229_v8 = vmax.f32 %v225_v7, 0.0 }
 0x1bc   :  { %282 = vmatmul.f32.gmra.mxu3 %v229_v8 }
 0x237   :  { %v280_v12 = vpop.f32.mrf.mxu3 }
 0x238   :  { %v286_v13 = vmax.f32 %v280_v12, 0.0 }
 0x23a   :  { %337 = vmatmul.f32.vlgmr.msrb.gmra.mxu0 %v286_v13 }
 0x23f   :  { %v283_v14 = vpop.f32.mrf.mxu3 }
 0x240   :  { %v287_v15 = vmax.f32 %v283_v14, 0.0 }
 0x242   :  { %340 = vmatmul.f32.vlgmr.msrb.gmra.mxu1 %v287_v15 }
 0x2b7   :  { %v338_v16 = vpop.f32.mrf.mxu0 }
 0x2b8   :  { %344 = vst [vmem:[%s659_s2] sm:$0xff] %v338_v16 }
 0x2bf   :  { %v341_v17 = vpop.f32.mrf.mxu1 }
 0x2c0   :  { %345 = vst [vmem:[%s659_s2 + $0x8] sm:$0xff] %v341_v17 }
 0x2c1   :  { %350 = vsyncpa [#allocation4], 1 }
 0x2c2   :  { %351 = vsyncpa [#allocation6], 1 }

</bundles_post_ra>
